<compile_context>
chip_gen: v7x
topology: tpu7x:2x2x1
jax: 0.10.0
libtpu: 0.0.40
codegen_flags: <defaults>
</compile_context>

<pallas_src>
from functools import partial

import jax
import jax.numpy as jnp
from jax.experimental import pallas as pl
from jax.experimental.pallas import tpu as pltpu


def _model_kernel(x_ref, p_ref, o_ref):
    # x_ref : (3, 16, TG) f32/bf16 VMEM block (channel, window-element, lane-dense G)
    # p_ref : (16,) f32 SMEM packed params:
    #         [0:9]  fc_1 weight, p[i*3+j] = w1[in=i, out=j]
    #         [9:12] fc_1 bias
    #         [12:15] fc_2 weight (in j -> out 0)
    #         [15]   fc_2 bias
    # o_ref : (1, TG) f32 VMEM block
    x0 = x_ref[0].astype(jnp.float32)          # (NW, TG)
    x1 = x_ref[1].astype(jnp.float32)
    x2 = x_ref[2].astype(jnp.float32)

    acc = None
    for j in range(3):
        # fc_1 output channel j: scalar-broadcast VPU FMAs (no MXU).
        yj = (x0 * p_ref[0 * 3 + j]
              + x1 * p_ref[1 * 3 + j]
              + x2 * p_ref[2 * 3 + j])                        # (NW, TG)
        # MaxPool2d(4,4): max over the 16 window elements (sublane-aligned axis).
        # Per-channel bias is constant -> add after the max.
        pj = jnp.max(yj, axis=0, keepdims=True) + p_ref[9 + j]   # (1, TG)
        term = pj * p_ref[12 + j]                             # fc_2 contribution
        acc = term if acc is None else acc + term

    o_ref[...] = acc + p_ref[15]                              # (1, TG) lane-dense store


@partial(jax.jit,
         static_argnames=("pool", "block_g", "stream_bf16", "input_fusion"))
def model_forward(x, w1, b1, w2, b2, *, pool=4, block_g=8192,
                  stream_bf16=False, input_fusion=False):
    """x: (B, H, W, C=3) f32 channels-last.  w1:(3,3) (in,out), b1:(3,),
    w2:(3,1) (in,out), b2:(1,).  Returns flattened (B*Ho*Wo,) f32."""
    B, H, W, C = x.shape
    assert C == 3, C
    assert H % pool == 0 and W % pool == 0, (H, W, pool)
    Ho, Wo = H // pool, W // pool
    G = B * Ho * Wo                 # pooled output positions (lane axis)
    NW = pool * pool                # elements per pooling window

    # Rearrange to (C, NW, G): x3d[c, hi*pool+wi, b*Ho*Wo+ho*Wo+wo]
    #   = x[b, ho*pool+hi, wo*pool+wi, c].  Single materialized copy under jit
    # (the pad / bf16 cast below fuse into it).
    xr = x.reshape(B, Ho, pool, Wo, pool, C)          # (b, ho, hi, wo, wi, c)
    xr = jnp.transpose(xr, (5, 2, 4, 0, 1, 3))        # (c, hi, wi, b, ho, wo)
    x3d = xr.reshape(C, NW, G)
    if stream_bf16:
        # Halves HBM bytes; kernel upcasts to f32 before any VPU math.
        x3d = x3d.astype(jnp.bfloat16)

    # Lane-tile G: tg multiple of 128 (<= block_g), clamped to round_up(G,128)
    # so tiny problems use a single exact tile.  Tail pad <= tg-1 lanes.
    lane = 128
    g128 = ((G + lane - 1) // lane) * lane
    tg = max(lane, (min(block_g, g128) // lane) * lane)
    g_pad = ((G + tg - 1) // tg) * tg
    if g_pad != G:
        x3d = jnp.pad(x3d, ((0, 0), (0, 0), (0, g_pad - G)))

    params = jnp.concatenate([w1.reshape(-1), b1.reshape(-1),
                              w2.reshape(-1), b2.reshape(-1)]).astype(jnp.float32)

    # Scoped-VMEM budget: 2 double-buffered input blocks + output blocks + slack.
    # Keeps large block_g working under v5e's 16 MiB scoped default; capped at
    # 64 MiB (v7x physical VMEM per TensorCore).
    in_bytes = C * NW * tg * (2 if stream_bf16 else 4)
    buf_bytes = 2 * in_bytes + 2 * (tg * 4)
    vmem_limit = int(min(64 * 1024 * 1024,
                         max(16 * 1024 * 1024, 2 * buf_bytes + (4 << 20))))

    out = pl.pallas_call(
        _model_kernel,
        out_shape=jax.ShapeDtypeStruct((1, g_pad), jnp.float32),
        grid=(g_pad // tg,),
        in_specs=[
            pl.BlockSpec((C, NW, tg), lambda g: (0, 0, g)),           # x slab (VMEM)
            pl.BlockSpec(memory_space=pltpu.MemorySpace.SMEM),        # packed params
        ],
        out_specs=pl.BlockSpec((1, tg), lambda g: (0, g)),
        compiler_params=pltpu.CompilerParams(
            dimension_semantics=("parallel",),     # megacore sharding on v7x
            vmem_limit_bytes=vmem_limit,
            allow_input_fusion=([True, False] if input_fusion else None),
        ),
    )(x3d, params)

    return out[0, :G]        # torch.flatten -> 1-D of size B*Ho*Wo


def reference_forward(x, w1, b1, w2, b2, *, pool=4):
    """Plain-JAX reference (same channels-last semantics, (in,out) weights)."""
    B, H, W, C = x.shape
    y = x @ w1 + b1                                            # (B, H, W, 3)
    y = y.reshape(B, H // pool, pool, W // pool, pool, 3)
    y = jnp.max(y, axis=(2, 4))                                # (B, Ho, Wo, 3)
    y = y @ w2 + b2                                            # (B, Ho, Wo, 1)
    return y.reshape(-1)


if __name__ == "__main__":
    key = jax.random.PRNGKey(0)
    kx, k1w, k1b, k2w, k2b, kx2 = jax.random.split(key, 6)

    # PyTorch-style uniform +-1/sqrt(fan_in) init, (in, out) weight layout.
    bound = 1.0 / jnp.sqrt(3.0)
    w1 = jax.random.uniform(k1w, (3, 3), jnp.float32, -bound, bound)
    b1 = jax.random.uniform(k1b, (3,), jnp.float32, -bound, bound)
    w2 = jax.random.uniform(k2w, (3, 1), jnp.float32, -bound, bound)
    b2 = jax.random.uniform(k2b, (1,), jnp.float32, -bound, bound)

    # --- Test 1: small shape, default (single-tile) config, f32 path.
    B, H, W, C = 2, 16, 16, 3
    x = jax.random.normal(kx, (B, H, W, C), dtype=jnp.float32)
    out = model_forward(x, w1, b1, w2, b2)
    jax.block_until_ready(out)
    ref = reference_forward(x, w1, b1, w2, b2)
    assert out.shape == (B * (H // 4) * (W // 4),), out.shape
    assert jnp.allclose(out, ref, atol=1e-5, rtol=1e-5), "mismatch vs reference (f32)"

    # --- Test 2: multi-tile grid + padded tail (block_g=512 -> grid=2) f32 path.
    B2, H2, W2 = 2, 64, 96
    x2 = jax.random.normal(kx2, (B2, H2, W2, C), dtype=jnp.float32)
    out2 = model_forward(x2, w1, b1, w2, b2, block_g=512)
    jax.block_until_ready(out2)
    ref2 = reference_forward(x2, w1, b1, w2, b2)
    assert out2.shape == ref2.shape, (out2.shape, ref2.shape)
    assert jnp.allclose(out2, ref2, atol=1e-5, rtol=1e-5), "mismatch vs reference (tiled)"

    # --- Test 3: bf16-streamed input slab (compare vs bf16-rounded-input reference).
    out3 = model_forward(x, w1, b1, w2, b2, stream_bf16=True)
    jax.block_until_ready(out3)
    x_bf = x.astype(jnp.bfloat16).astype(jnp.float32)
    ref3 = reference_forward(x_bf, w1, b1, w2, b2)
    assert jnp.allclose(out3, ref3, atol=1e-3, rtol=1e-3), "mismatch vs reference (bf16)"

    print("KERNEL_OK")
</pallas_src>

<mosaic_0001>
module attributes {stable_mosaic.version = 11 : i64} {
  func.func @_model_kernel(%arg0: i32, %arg1: memref<3x16x128xf32, #tpu.memory_space<vmem>>, %arg2: memref<16xf32, #tpu.memory_space<smem>>, %arg3: memref<1x128xf32, #tpu.memory_space<vmem>>) attributes {dimension_semantics = [#tpu.dimension_semantics<parallel>], iteration_bounds = array<i64: 1>, scalar_prefetch = 0 : i64, scratch_operands = 0 : i64, tpu.core_type = #tpu.core_type<tc>, window_params = [{transform_indices = @transform_0, window_bounds = array<i64: 3, 16, 128>}, {transform_indices = @transform_1, window_bounds = array<i64: 16>}, {transform_indices = @transform_2, window_bounds = array<i64: 1, 128>}]} {
    %c0 = arith.constant 0 : index
    %c0_0 = arith.constant 0 : index
    %c0_1 = arith.constant 0 : index
    %0 = vector.load %arg1[%c0, %c0_0, %c0_1] : memref<3x16x128xf32, #tpu.memory_space<vmem>>, vector<1x16x128xf32>
    %1 = vector.shape_cast %0 : vector<1x16x128xf32> to vector<16x128xf32>
    %c1 = arith.constant 1 : index
    %c0_2 = arith.constant 0 : index
    %c0_3 = arith.constant 0 : index
    %2 = vector.load %arg1[%c1, %c0_2, %c0_3] : memref<3x16x128xf32, #tpu.memory_space<vmem>>, vector<1x16x128xf32>
    %3 = vector.shape_cast %2 : vector<1x16x128xf32> to vector<16x128xf32>
    %c2 = arith.constant 2 : index
    %c0_4 = arith.constant 0 : index
    %c0_5 = arith.constant 0 : index
    %4 = vector.load %arg1[%c2, %c0_4, %c0_5] : memref<3x16x128xf32, #tpu.memory_space<vmem>>, vector<1x16x128xf32>
    %5 = vector.shape_cast %4 : vector<1x16x128xf32> to vector<16x128xf32>
    %c0_6 = arith.constant 0 : index
    %6 = memref.load %arg2[%c0_6] : memref<16xf32, #tpu.memory_space<smem>>
    %7 = vector.broadcast %6 : f32 to vector<16x128xf32>
    %8 = arith.mulf %1, %7 : vector<16x128xf32>
    %c3 = arith.constant 3 : index
    %9 = memref.load %arg2[%c3] : memref<16xf32, #tpu.memory_space<smem>>
    %10 = vector.broadcast %9 : f32 to vector<16x128xf32>
    %11 = arith.mulf %3, %10 : vector<16x128xf32>
    %12 = arith.addf %8, %11 : vector<16x128xf32>
    %c6 = arith.constant 6 : index
    %13 = memref.load %arg2[%c6] : memref<16xf32, #tpu.memory_space<smem>>
    %14 = vector.broadcast %13 : f32 to vector<16x128xf32>
    %15 = arith.mulf %5, %14 : vector<16x128xf32>
    %16 = arith.addf %12, %15 : vector<16x128xf32>
    %cst = arith.constant dense<0xFF800000> : vector<128xf32>
    %17 = vector.multi_reduction <maximumf>, %16, %cst [0] : vector<16x128xf32> to vector<128xf32>
    %18 = vector.shape_cast %17 : vector<128xf32> to vector<1x128xf32>
    %c9 = arith.constant 9 : index
    %19 = memref.load %arg2[%c9] : memref<16xf32, #tpu.memory_space<smem>>
    %20 = vector.broadcast %19 : f32 to vector<1x128xf32>
    %21 = arith.addf %18, %20 : vector<1x128xf32>
    %c12 = arith.constant 12 : index
    %22 = memref.load %arg2[%c12] : memref<16xf32, #tpu.memory_space<smem>>
    %23 = vector.broadcast %22 : f32 to vector<1x128xf32>
    %24 = arith.mulf %21, %23 : vector<1x128xf32>
    %c1_7 = arith.constant 1 : index
    %25 = memref.load %arg2[%c1_7] : memref<16xf32, #tpu.memory_space<smem>>
    %26 = vector.broadcast %25 : f32 to vector<16x128xf32>
    %27 = arith.mulf %1, %26 : vector<16x128xf32>
    %c4 = arith.constant 4 : index
    %28 = memref.load %arg2[%c4] : memref<16xf32, #tpu.memory_space<smem>>
    %29 = vector.broadcast %28 : f32 to vector<16x128xf32>
    %30 = arith.mulf %3, %29 : vector<16x128xf32>
    %31 = arith.addf %27, %30 : vector<16x128xf32>
    %c7 = arith.constant 7 : index
    %32 = memref.load %arg2[%c7] : memref<16xf32, #tpu.memory_space<smem>>
    %33 = vector.broadcast %32 : f32 to vector<16x128xf32>
    %34 = arith.mulf %5, %33 : vector<16x128xf32>
    %35 = arith.addf %31, %34 : vector<16x128xf32>
    %cst_8 = arith.constant dense<0xFF800000> : vector<128xf32>
    %36 = vector.multi_reduction <maximumf>, %35, %cst_8 [0] : vector<16x128xf32> to vector<128xf32>
    %37 = vector.shape_cast %36 : vector<128xf32> to vector<1x128xf32>
    %c10 = arith.constant 10 : index
    %38 = memref.load %arg2[%c10] : memref<16xf32, #tpu.memory_space<smem>>
    %39 = vector.broadcast %38 : f32 to vector<1x128xf32>
    %40 = arith.addf %37, %39 : vector<1x128xf32>
    %c13 = arith.constant 13 : index
    %41 = memref.load %arg2[%c13] : memref<16xf32, #tpu.memory_space<smem>>
    %42 = vector.broadcast %41 : f32 to vector<1x128xf32>
    %43 = arith.mulf %40, %42 : vector<1x128xf32>
    %44 = arith.addf %24, %43 : vector<1x128xf32>
    %c2_9 = arith.constant 2 : index
    %45 = memref.load %arg2[%c2_9] : memref<16xf32, #tpu.memory_space<smem>>
    %46 = vector.broadcast %45 : f32 to vector<16x128xf32>
    %47 = arith.mulf %1, %46 : vector<16x128xf32>
    %c5 = arith.constant 5 : index
    %48 = memref.load %arg2[%c5] : memref<16xf32, #tpu.memory_space<smem>>
    %49 = vector.broadcast %48 : f32 to vector<16x128xf32>
    %50 = arith.mulf %3, %49 : vector<16x128xf32>
    %51 = arith.addf %47, %50 : vector<16x128xf32>
    %c8 = arith.constant 8 : index
    %52 = memref.load %arg2[%c8] : memref<16xf32, #tpu.memory_space<smem>>
    %53 = vector.broadcast %52 : f32 to vector<16x128xf32>
    %54 = arith.mulf %5, %53 : vector<16x128xf32>
    %55 = arith.addf %51, %54 : vector<16x128xf32>
    %cst_10 = arith.constant dense<0xFF800000> : vector<128xf32>
    %56 = vector.multi_reduction <maximumf>, %55, %cst_10 [0] : vector<16x128xf32> to vector<128xf32>
    %57 = vector.shape_cast %56 : vector<128xf32> to vector<1x128xf32>
    %c11 = arith.constant 11 : index
    %58 = memref.load %arg2[%c11] : memref<16xf32, #tpu.memory_space<smem>>
    %59 = vector.broadcast %58 : f32 to vector<1x128xf32>
    %60 = arith.addf %57, %59 : vector<1x128xf32>
    %c14 = arith.constant 14 : index
    %61 = memref.load %arg2[%c14] : memref<16xf32, #tpu.memory_space<smem>>
    %62 = vector.broadcast %61 : f32 to vector<1x128xf32>
    %63 = arith.mulf %60, %62 : vector<1x128xf32>
    %64 = arith.addf %44, %63 : vector<1x128xf32>
    %c15 = arith.constant 15 : index
    %65 = memref.load %arg2[%c15] : memref<16xf32, #tpu.memory_space<smem>>
    %66 = vector.broadcast %65 : f32 to vector<1x128xf32>
    %67 = arith.addf %64, %66 : vector<1x128xf32>
    %c0_11 = arith.constant 0 : index
    %c0_12 = arith.constant 0 : index
    %68 = vector.load %arg3[%c0_11, %c0_12] : memref<1x128xf32, #tpu.memory_space<vmem>>, vector<1x128xf32>
    tpu.vector_store %arg3[%c0_11, %c0_12], %67 {strides = array<i32>} : memref<1x128xf32, #tpu.memory_space<vmem>>, vector<1x128xf32>,
    return
  }
  func.func @transform_0(%arg0: i32) -> (i32, i32, i32) {
    %c0_i32 = arith.constant 0 : i32
    %c0_i32_0 = arith.constant 0 : i32
    %c0_i32_1 = arith.constant 0 : i32
    return %c0_i32, %c0_i32_0, %arg0 : i32, i32, i32
  }
  func.func @transform_1(%arg0: i32) -> i32 {
    %c0_i32 = arith.constant 0 : i32
    %c0_i32_0 = arith.constant 0 : i32
    return %c0_i32 : i32
  }
  func.func @transform_2(%arg0: i32) -> (i32, i32) {
    %c0_i32 = arith.constant 0 : i32
    %c0_i32_0 = arith.constant 0 : i32
    return %c0_i32, %arg0 : i32, i32
  }
}

</mosaic_0001>

<bundles_post_ra>
// kernel: model_forward.1
= control target key start
LH: loop header
LB: loop body
LE: loop exit
PB: predicated region body
PF: predicated region fallthrough
CT: control target
= control target key end

     0   :  { %7 = vsyncpa [#allocation3], 0  ;;  %s210_s0 = inlined_call_operand.vmem [shape: f32[3,16,128], index: 0, kind: input, shape index: {}]   ;;  %s211_s1 = inlined_call_operand.vmem [shape: f32[16], index: 1, kind: input, shape index: {}]   ;;  %s212_s2 = inlined_call_operand.vmem [shape: f32[1,128], index: 2, kind: output, shape index: {}]  }
   0x1   :  { %s16_s11 = sshll.u32 %s211_s1, 4  ;;  %s17_s11 = int_to_ptr.vmem [resolvable:$true] %s16_s11 }
   0x2   :  { %s150_s12 = scalar_lea.vmem %s17_s11, 16  ;;  %p155_p1 = scmp.lt.s32.totalorder %s17_s11, %s17_s11 }
   0x3   :  { %p151_p0 = scmp.ne.s32.totalorder %s17_s11, %s150_s12  ;;  %p156_p2 = scmp.lt.s32.totalorder %s150_s12, %s150_s12 }
   0x5   :  { %p157_p3 = por %p156_p2, %p155_p1 }
   0x7   :  { %p158_p4 = pnand %p157_p3, %p151_p0 }
   0x9   :  { %161 = shalt.err (!%p158_p4)
}
   0xa   :  { %s164_s13 = smov [#allocation2]  }
   0xb   :  { %19 = dma.vmem_to_smem %s17_s11, 16, %s164_s13, [#allocation3]  }
   0xc   :  { %162 = dma.done.wait [#allocation3], 16  }
   0xd   :  { %163 = vsyncadd [#allocation3], 4294967280 }
   0xe   :  { %23 = sfence }
   0xf   :  { %s32_s14 = sld [smem:[#allocation2]]  ;;  %s134_s15 = sld [smem:[#allocation2 + $0x3]]  ;;  %v24_v0 = vld [vmem:[%s210_s0] sm:$0xff]  ;;  %v25_v1 = vld [vmem:[%s210_s0 + $0x8] sm:$0xff]  ;;  %v130_v2 = vld [vmem:[%s210_s0 + $0x10] sm:$0xff] }
  0x10   :  { %s135_s16 = sld [smem:[#allocation2 + $0x6]]  ;;  %s138_s17 = sld [smem:[#allocation2 + $0x1]]  ;;  %v131_v3 = vld [vmem:[%s210_s0 + $0x18] sm:$0xff]  ;;  %v132_v4 = vld [vmem:[%s210_s0 + $0x20] sm:$0xff]  ;;  %v133_v5 = vld [vmem:[%s210_s0 + $0x28] sm:$0xff] }
  0x11   :  { %s139_s21 = sld [smem:[#allocation2 + $0x4]]  ;;  %s140_s22 = sld [smem:[#allocation2 + $0x7]] }
  0x12   :  { %s143_s3 = sld [smem:[#allocation2 + $0x2]]  ;;  %s201_s4 = sld [smem:[#allocation2 + $0x5]] }
  0x13   :  { %s203_s5 = sld [smem:[#allocation2 + $0x8]]  ;;  %s136_s0 = sld [smem:[#allocation2 + $0x9]] }
  0x14   :  { %s137_s6 = sld [smem:[#allocation2 + $0xc]]  ;;  %s141_s7 = sld [smem:[#allocation2 + $0xa]] }
  0x15   :  { %v33_v6 = vstv %s32_s14  ;;  %v37_v9 = vstv %s134_s15  ;;  %s142_s8 = sld [smem:[#allocation2 + $0xd]]  ;;  %s146_s9 = sld [smem:[#allocation2 + $0xb]] }
  0x16   :  { %v34_v7 = vmul.f32 %v33_v6, %v24_v0  ;;  %v35_v8 = vmul.f32 %v33_v6, %v25_v1  ;;  %v38_v10 = vmul.f32 %v130_v2, %v37_v9  ;;  %v39_v11 = vmul.f32 %v131_v3, %v37_v9  ;;  %s147_s10 = sld [smem:[#allocation2 + $0xe]]  ;;  %s148_s11 = sld [smem:[#allocation2 + $0xf]] }
  0x17   :  { %v43_v12 = vstv %s135_s16  ;;  %v62_v15 = vstv %s138_s17  ;;  %v66_v20 = vstv %s139_s21  ;;  %v72_v21 = vstv %s140_s22 }
  0x18   :  { %v44_v13 = vmul.f32 %v132_v4, %v43_v12  ;;  %v45_v14 = vmul.f32 %v133_v5, %v43_v12  ;;  %v40_v16 = vadd.f32 %v38_v10, %v34_v7  ;;  %v41_v17 = vadd.f32 %v39_v11, %v35_v8 }
  0x19   :  { %v63_v18 = vmul.f32 %v62_v15, %v24_v0  ;;  %v64_v19 = vmul.f32 %v62_v15, %v25_v1  ;;  %v67_v24 = vmul.f32 %v130_v2, %v66_v20  ;;  %v68_v25 = vmul.f32 %v131_v3, %v66_v20 }
  0x1a   :  { %v46_v22 = vadd.f32 %v44_v13, %v40_v16  ;;  %v47_v23 = vadd.f32 %v45_v14, %v41_v17  ;;  %v73_v26 = vmul.f32 %v132_v4, %v72_v21  ;;  %v74_v27 = vmul.f32 %v133_v5, %v72_v21 }
  0x1b   :  { %v92_v28 = vstv %s143_s3  ;;  %v96_v29 = vstv %s201_s4  ;;  %v69_v31 = vadd.f32 %v67_v24, %v63_v18  ;;  %v70_v32 = vadd.f32 %v68_v25, %v64_v19 }
  0x1c   :  { %v48_v30 = vmax.f32 %v46_v22, %v47_v23  ;;  %v93_v33 = vmul.f32 %v92_v28, %v24_v0  ;;  %v94_v34 = vmul.f32 %v92_v28, %v25_v1  ;;  %v97_v35 = vmul.f32 %v130_v2, %v96_v29 }
  0x1d   :  { %v98_v36 = vmul.f32 %v131_v3, %v96_v29  ;;  %v102_v37 = vstv %s203_s5  ;;  %v75_v39 = vadd.f32 %v73_v26, %v69_v31  ;;  %v76_v40 = vadd.f32 %v74_v27, %v70_v32 }
  0x1e   :  { %v49_v38 = vrot.slane %v48_v30, 4  ;;  %v103_v41 = vmul.f32 %v132_v4, %v102_v37  ;;  %v99_v42 = vadd.f32 %v97_v35, %v93_v33  ;;  %v104_v44 = vmul.f32 %v133_v5, %v102_v37 }
  0x1f   :  { %v100_v43 = vadd.f32 %v98_v36, %v94_v34  ;;  %v77_v46 = vmax.f32 %v75_v39, %v76_v40  ;;  %v56_v57 = vstv %s136_s0  ;;  %v59_v0 = vstv %s137_s6 }
  0x20   :  { %v50_v45 = vmax.f32 %v48_v30, %v49_v38  ;;  %v105_v47 = vadd.f32 %v103_v41, %v99_v42  ;;  %v85_v1 = vstv %s141_s7  ;;  %v88_v4 = vstv %s142_s8 }
  0x21   :  { %v106_v48 = vadd.f32 %v104_v44, %v100_v43  ;;  %v78_v50 = vrot.slane %v77_v46, 4  ;;  %v115_v8 = vstv %s146_s9  ;;  %v118_v11 = vstv %s147_s10 }
  0x22   :  { %v51_v49 = vrot.slane %v50_v45, 2  ;;  %v122_v15 = vstv %s148_s11 }
  0x23   :  { %v107_v51 = vmax.f32 %v105_v47, %v106_v48  ;;  %v79_v53 = vmax.f32 %v77_v46, %v78_v50 }
  0x24   :  { %v52_v52 = vmax.f32 %v50_v45, %v51_v49 }
  0x25   :  { %v108_v54 = vrot.slane %v107_v51, 4  ;;  %v80_v56 = vrot.slane %v79_v53, 2 }
  0x26   :  { %v53_v55 = vrot.slane %v52_v52, 1 }
  0x27   :  { %v109_v58 = vmax.f32 %v107_v51, %v108_v54  ;;  %v81_v60 = vmax.f32 %v79_v53, %v80_v56 }
  0x28   :  { %v54_v59 = vmax.f32 %v52_v52, %v53_v55 }
  0x29   :  { %v110_v61 = vrot.slane %v109_v58, 2  ;;  %v82_v63 = vrot.slane %v81_v60, 1 }
  0x2a   :  { %v57_v62 = vadd.f32 %v56_v57, %v54_v59 }
  0x2b   :  { %v111_v2 = vmax.f32 %v109_v58, %v110_v61  ;;  %v83_v3 = vmax.f32 %v81_v60, %v82_v63 }
  0x2c   :  { %v60_v6 = vmul.f32 %v59_v0, %v57_v62 }
  0x2d   :  { %v112_v5 = vrot.slane %v111_v2, 1  ;;  %v86_v7 = vadd.f32 %v85_v1, %v83_v3 }
  0x2f   :  { %v113_v9 = vmax.f32 %v111_v2, %v112_v5  ;;  %v89_v10 = vmul.f32 %v88_v4, %v86_v7 }
  0x31   :  { %v116_v12 = vadd.f32 %v115_v8, %v113_v9  ;;  %v90_v13 = vadd.f32 %v89_v10, %v60_v6 }
  0x33   :  { %v119_v14 = vmul.f32 %v118_v11, %v116_v12 }
  0x35   :  { %v120_v16 = vadd.f32 %v119_v14, %v90_v13 }
  0x37   :  { %v123_v17 = vadd.f32 %v122_v15, %v120_v16 }
  0x39   :  { %124 = vst [vmem:[%s212_s2] sm:$0x1] %v123_v17 }
  0x3a   :  { %129 = vsyncpa [#allocation3], 1 }

</bundles_post_ra>
